<compile_context>
chip_gen: v5e
topology: v5e:2x2
jax: 0.10.0
libtpu: 0.0.40
codegen_flags: <defaults>
</compile_context>

<pallas_src>
import functools

import jax
import jax.numpy as jnp
from jax.experimental import pallas as pl
from jax.experimental.pallas import tpu as pltpu


def _round_up(x, m):
    return ((x + m - 1) // m) * m


def _angle_resnet_kernel(*refs, no_blocks):
    # refs: x, w_in, b_in, (w1, b1, w2, b2) * no_blocks, w_out, b_out, o
    x_ref = refs[0]
    w_in_ref, b_in_ref = refs[1], refs[2]
    block_refs = refs[3:3 + 4 * no_blocks]
    w_out_ref = refs[3 + 4 * no_blocks]
    b_out_ref = refs[4 + 4 * no_blocks]
    o_ref = refs[5 + 4 * no_blocks]

    def dot(a, w_ref):
        # Cast activations to the weight dtype (f32 or bf16 MXU operands),
        # always accumulate in f32 on the MXU.
        return jnp.dot(a.astype(w_ref.dtype), w_ref[...],
                       preferred_element_type=jnp.float32)

    x = jnp.maximum(x_ref[...].astype(jnp.float32), 0.0)          # relu(s)
    h = dot(x, w_in_ref) + b_in_ref[...].astype(jnp.float32)      # linear_in

    for i in range(no_blocks):                                     # resnet blocks
        w1, b1, w2, b2 = block_refs[4 * i: 4 * i + 4]
        a = jnp.maximum(h, 0.0)
        a = dot(a, w1) + b1[...].astype(jnp.float32)
        a = jnp.maximum(a, 0.0)
        a = dot(a, w2) + b2[...].astype(jnp.float32)
        h = h + a                                                  # residual

    h = jnp.maximum(h, 0.0)                                        # relu
    out = dot(h, w_out_ref) + b_out_ref[...].astype(jnp.float32)   # linear_out
    o_ref[...] = out.astype(o_ref.dtype)


def pred_angle_points_forward(s, params, *, tile_m=512):
    """s: (..., c_s); params: output of prepare_kernel_params (pre-transposed)."""
    w_in, b_in, blocks, w_out, b_out = params
    c_s = s.shape[-1]
    no_angles = w_out.shape[1]
    no_blocks = len(blocks)
    lead = s.shape[:-1]

    x = s.reshape(-1, c_s)
    n = x.shape[0]

    # Row tile: multiple of 8 sublanes, capped at tile_m; pad batch to a tile multiple.
    tm = min(tile_m, _round_up(max(n, 1), 8))
    n_pad = _round_up(n, tm)
    if n_pad != n:
        x = jnp.pad(x, ((0, n_pad - n), (0, 0)))

    flat_params = [w_in, b_in]
    for blk in blocks:
        flat_params.extend(blk)
    flat_params.extend([w_out, b_out])

    def resident_spec(p):
        # Full-array block, same block index every grid step -> stays in VMEM.
        return pl.BlockSpec(p.shape, lambda i, _nd=p.ndim: (0,) * _nd)

    in_specs = ([pl.BlockSpec((tm, c_s), lambda i: (i, 0))]
                + [resident_spec(p) for p in flat_params])

    out = pl.pallas_call(
        functools.partial(_angle_resnet_kernel, no_blocks=no_blocks),
        out_shape=jax.ShapeDtypeStruct((n_pad, no_angles), s.dtype),
        grid_spec=pltpu.PrefetchScalarGridSpec(
            num_scalar_prefetch=0,
            grid=(n_pad // tm,),
            in_specs=in_specs,
            out_specs=pl.BlockSpec((tm, no_angles), lambda i: (i, 0)),
        ),
        compiler_params=pltpu.CompilerParams(
            dimension_semantics=("parallel",)),   # independent row tiles -> v7x megacore
    )(x, *flat_params)

    return out[:n].reshape(*lead, no_angles)


def init_pred_angle_points_params(key, c_s, c_resnet, no_resnet_blocks=2,
                                  no_angles=4, dtype=jnp.float32):
    """PyTorch nn.Linear-style params: weights (out, in), U(-1/sqrt(fan_in), ...)."""
    keys = jax.random.split(key, 2 + no_resnet_blocks)

    def linear(k, fan_in, fan_out):
        kw, kb = jax.random.split(k)
        bound = 1.0 / (fan_in ** 0.5)
        w = jax.random.uniform(kw, (fan_out, fan_in), dtype, -bound, bound)
        b = jax.random.uniform(kb, (fan_out,), dtype, -bound, bound)
        return w, b

    w_in, b_in = linear(keys[0], c_s, c_resnet)
    blocks = []
    for i in range(no_resnet_blocks):
        k1, k2 = jax.random.split(keys[1 + i])
        blocks.append((*linear(k1, c_resnet, c_resnet),
                       *linear(k2, c_resnet, c_resnet)))
    w_out, b_out = linear(keys[1 + no_resnet_blocks], c_resnet, no_angles)
    # Note: AngleResnet.linear_initial exists in the module but is unused in forward().
    return (w_in, b_in, tuple(blocks), w_out, b_out)


def prepare_kernel_params(pt_params, mxu_dtype=None):
    """One-time conversion: weights -> (in, out) [optionally bf16], biases -> (1, out) f32."""
    w_in, b_in, blocks, w_out, b_out = pt_params

    def cvt_w(w):
        w = jnp.transpose(w)
        return w if mxu_dtype is None else w.astype(mxu_dtype)

    def cvt_b(b):
        return b.reshape(1, -1).astype(jnp.float32)

    k_blocks = tuple((cvt_w(w1), cvt_b(b1), cvt_w(w2), cvt_b(b2))
                     for (w1, b1, w2, b2) in blocks)
    return (cvt_w(w_in), cvt_b(b_in), k_blocks, cvt_w(w_out), cvt_b(b_out))


def ref_forward(s, pt_params):
    """Pure-JAX reference in PyTorch layout."""
    w_in, b_in, blocks, w_out, b_out = pt_params
    x = jnp.maximum(s, 0.0) @ w_in.T + b_in
    for (w1, b1, w2, b2) in blocks:
        a = jnp.maximum(x, 0.0) @ w1.T + b1
        a = jnp.maximum(a, 0.0) @ w2.T + b2
        x = x + a
    x = jnp.maximum(x, 0.0) @ w_out.T + b_out
    return x


if __name__ == "__main__":
    # Pred_angle_Points(c_s=32, c_resnet=64, no_resnet_blocks=2, no_angles=4)
    c_s, c_resnet, no_resnet_blocks, no_angles = 32, 64, 2, 4
    key = jax.random.PRNGKey(0)
    ks, kp = jax.random.split(key)

    # Input with arbitrary leading dims: (batch=2, seq=16, c_s=32)
    s = jax.random.normal(ks, (2, 16, c_s), dtype=jnp.float32)
    pt_params = init_pred_angle_points_params(kp, c_s, c_resnet,
                                              no_resnet_blocks, no_angles)
    ref = ref_forward(s, pt_params)

    # f32 MXU operand path (exact module semantics).
    params_f32 = prepare_kernel_params(pt_params)
    out = jax.block_until_ready(pred_angle_points_forward(s, params_f32))
    assert out.shape == (2, 16, no_angles)
    assert jnp.allclose(out, ref, atol=1e-4, rtol=1e-4)

    # bf16 MXU operand path (review feedback for v5e/v6e/v7x MXU throughput),
    # still accumulating in f32 with f32 bias/ReLU/residual.
    params_bf16 = prepare_kernel_params(pt_params, mxu_dtype=jnp.bfloat16)
    out_bf16 = jax.block_until_ready(pred_angle_points_forward(s, params_bf16))
    assert out_bf16.shape == (2, 16, no_angles)
    assert jnp.allclose(out_bf16, ref, atol=1e-1, rtol=1e-1)

    print("KERNEL_OK")
</pallas_src>

<mosaic_0001>
module attributes {stable_mosaic.version = 11 : i64} {
  func.func @_angle_resnet_kernel(%arg0: i32, %arg1: memref<32x32xf32, #tpu.memory_space<vmem>>, %arg2: memref<32x64xf32, #tpu.memory_space<vmem>>, %arg3: memref<1x64xf32, #tpu.memory_space<vmem>>, %arg4: memref<64x64xf32, #tpu.memory_space<vmem>>, %arg5: memref<1x64xf32, #tpu.memory_space<vmem>>, %arg6: memref<64x64xf32, #tpu.memory_space<vmem>>, %arg7: memref<1x64xf32, #tpu.memory_space<vmem>>, %arg8: memref<64x64xf32, #tpu.memory_space<vmem>>, %arg9: memref<1x64xf32, #tpu.memory_space<vmem>>, %arg10: memref<64x64xf32, #tpu.memory_space<vmem>>, %arg11: memref<1x64xf32, #tpu.memory_space<vmem>>, %arg12: memref<64x4xf32, #tpu.memory_space<vmem>>, %arg13: memref<1x4xf32, #tpu.memory_space<vmem>>, %arg14: memref<32x4xf32, #tpu.memory_space<vmem>>) attributes {dimension_semantics = [#tpu.dimension_semantics<parallel>], iteration_bounds = array<i64: 1>, scalar_prefetch = 0 : i64, scratch_operands = 0 : i64, tpu.core_type = #tpu.core_type<tc>, window_params = [{transform_indices = @transform_0, window_bounds = array<i64: 32, 32>}, {pipeline_mode = #tpu.pipeline_mode<synchronous>, transform_indices = @transform_1, window_bounds = array<i64: 32, 64>}, {pipeline_mode = #tpu.pipeline_mode<synchronous>, transform_indices = @transform_2, window_bounds = array<i64: 1, 64>}, {pipeline_mode = #tpu.pipeline_mode<synchronous>, transform_indices = @transform_3, window_bounds = array<i64: 64, 64>}, {pipeline_mode = #tpu.pipeline_mode<synchronous>, transform_indices = @transform_4, window_bounds = array<i64: 1, 64>}, {pipeline_mode = #tpu.pipeline_mode<synchronous>, transform_indices = @transform_5, window_bounds = array<i64: 64, 64>}, {pipeline_mode = #tpu.pipeline_mode<synchronous>, transform_indices = @transform_6, window_bounds = array<i64: 1, 64>}, {pipeline_mode = #tpu.pipeline_mode<synchronous>, transform_indices = @transform_7, window_bounds = array<i64: 64, 64>}, {pipeline_mode = #tpu.pipeline_mode<synchronous>, transform_indices = @transform_8, window_bounds = array<i64: 1, 64>}, {pipeline_mode = #tpu.pipeline_mode<synchronous>, transform_indices = @transform_9, window_bounds = array<i64: 64, 64>}, {pipeline_mode = #tpu.pipeline_mode<synchronous>, transform_indices = @transform_10, window_bounds = array<i64: 1, 64>}, {pipeline_mode = #tpu.pipeline_mode<synchronous>, transform_indices = @transform_11, window_bounds = array<i64: 64, 4>}, {pipeline_mode = #tpu.pipeline_mode<synchronous>, transform_indices = @transform_12, window_bounds = array<i64: 1, 4>}, {transform_indices = @transform_13, window_bounds = array<i64: 32, 4>}]} {
    %c0 = arith.constant 0 : index
    %c0_0 = arith.constant 0 : index
    %0 = vector.load %arg1[%c0, %c0_0] : memref<32x32xf32, #tpu.memory_space<vmem>>, vector<32x32xf32>
    %cst = arith.constant 0.000000e+00 : f32
    %1 = vector.broadcast %cst : f32 to vector<32x32xf32>
    %2 = arith.maximumf %0, %1 : vector<32x32xf32>
    %c0_1 = arith.constant 0 : index
    %c0_2 = arith.constant 0 : index
    %3 = vector.load %arg2[%c0_1, %c0_2] : memref<32x64xf32, #tpu.memory_space<vmem>>, vector<32x64xf32>
    %cst_3 = arith.constant dense<0.000000e+00> : vector<32x64xf32>
    %4 = tpu.matmul %2, %3, %cst_3 {dimension_numbers = #tpu.dot_dimension_numbers<[1], [0], [0], [1], [0, 0, 1, 1], [], []>} : vector<32x32xf32>, vector<32x64xf32>, vector<32x64xf32> -> vector<32x64xf32>
    %c0_4 = arith.constant 0 : index
    %c0_5 = arith.constant 0 : index
    %5 = vector.load %arg3[%c0_4, %c0_5] : memref<1x64xf32, #tpu.memory_space<vmem>>, vector<1x64xf32>
    %6 = vector.broadcast %5 : vector<1x64xf32> to vector<32x64xf32>
    %7 = arith.addf %4, %6 : vector<32x64xf32>
    %cst_6 = arith.constant 0.000000e+00 : f32
    %8 = vector.broadcast %cst_6 : f32 to vector<32x64xf32>
    %9 = arith.maximumf %7, %8 : vector<32x64xf32>
    %c0_7 = arith.constant 0 : index
    %c0_8 = arith.constant 0 : index
    %10 = vector.load %arg4[%c0_7, %c0_8] : memref<64x64xf32, #tpu.memory_space<vmem>>, vector<64x64xf32>
    %cst_9 = arith.constant dense<0.000000e+00> : vector<32x64xf32>
    %11 = tpu.matmul %9, %10, %cst_9 {dimension_numbers = #tpu.dot_dimension_numbers<[1], [0], [0], [1], [0, 0, 1, 1], [], []>} : vector<32x64xf32>, vector<64x64xf32>, vector<32x64xf32> -> vector<32x64xf32>
    %c0_10 = arith.constant 0 : index
    %c0_11 = arith.constant 0 : index
    %12 = vector.load %arg5[%c0_10, %c0_11] : memref<1x64xf32, #tpu.memory_space<vmem>>, vector<1x64xf32>
    %13 = vector.broadcast %12 : vector<1x64xf32> to vector<32x64xf32>
    %14 = arith.addf %11, %13 : vector<32x64xf32>
    %cst_12 = arith.constant 0.000000e+00 : f32
    %15 = vector.broadcast %cst_12 : f32 to vector<32x64xf32>
    %16 = arith.maximumf %14, %15 : vector<32x64xf32>
    %c0_13 = arith.constant 0 : index
    %c0_14 = arith.constant 0 : index
    %17 = vector.load %arg6[%c0_13, %c0_14] : memref<64x64xf32, #tpu.memory_space<vmem>>, vector<64x64xf32>
    %cst_15 = arith.constant dense<0.000000e+00> : vector<32x64xf32>
    %18 = tpu.matmul %16, %17, %cst_15 {dimension_numbers = #tpu.dot_dimension_numbers<[1], [0], [0], [1], [0, 0, 1, 1], [], []>} : vector<32x64xf32>, vector<64x64xf32>, vector<32x64xf32> -> vector<32x64xf32>
    %c0_16 = arith.constant 0 : index
    %c0_17 = arith.constant 0 : index
    %19 = vector.load %arg7[%c0_16, %c0_17] : memref<1x64xf32, #tpu.memory_space<vmem>>, vector<1x64xf32>
    %20 = vector.broadcast %19 : vector<1x64xf32> to vector<32x64xf32>
    %21 = arith.addf %18, %20 : vector<32x64xf32>
    %22 = arith.addf %7, %21 : vector<32x64xf32>
    %cst_18 = arith.constant 0.000000e+00 : f32
    %23 = vector.broadcast %cst_18 : f32 to vector<32x64xf32>
    %24 = arith.maximumf %22, %23 : vector<32x64xf32>
    %c0_19 = arith.constant 0 : index
    %c0_20 = arith.constant 0 : index
    %25 = vector.load %arg8[%c0_19, %c0_20] : memref<64x64xf32, #tpu.memory_space<vmem>>, vector<64x64xf32>
    %cst_21 = arith.constant dense<0.000000e+00> : vector<32x64xf32>
    %26 = tpu.matmul %24, %25, %cst_21 {dimension_numbers = #tpu.dot_dimension_numbers<[1], [0], [0], [1], [0, 0, 1, 1], [], []>} : vector<32x64xf32>, vector<64x64xf32>, vector<32x64xf32> -> vector<32x64xf32>
    %c0_22 = arith.constant 0 : index
    %c0_23 = arith.constant 0 : index
    %27 = vector.load %arg9[%c0_22, %c0_23] : memref<1x64xf32, #tpu.memory_space<vmem>>, vector<1x64xf32>
    %28 = vector.broadcast %27 : vector<1x64xf32> to vector<32x64xf32>
    %29 = arith.addf %26, %28 : vector<32x64xf32>
    %cst_24 = arith.constant 0.000000e+00 : f32
    %30 = vector.broadcast %cst_24 : f32 to vector<32x64xf32>
    %31 = arith.maximumf %29, %30 : vector<32x64xf32>
    %c0_25 = arith.constant 0 : index
    %c0_26 = arith.constant 0 : index
    %32 = vector.load %arg10[%c0_25, %c0_26] : memref<64x64xf32, #tpu.memory_space<vmem>>, vector<64x64xf32>
    %cst_27 = arith.constant dense<0.000000e+00> : vector<32x64xf32>
    %33 = tpu.matmul %31, %32, %cst_27 {dimension_numbers = #tpu.dot_dimension_numbers<[1], [0], [0], [1], [0, 0, 1, 1], [], []>} : vector<32x64xf32>, vector<64x64xf32>, vector<32x64xf32> -> vector<32x64xf32>
    %c0_28 = arith.constant 0 : index
    %c0_29 = arith.constant 0 : index
    %34 = vector.load %arg11[%c0_28, %c0_29] : memref<1x64xf32, #tpu.memory_space<vmem>>, vector<1x64xf32>
    %35 = vector.broadcast %34 : vector<1x64xf32> to vector<32x64xf32>
    %36 = arith.addf %33, %35 : vector<32x64xf32>
    %37 = arith.addf %22, %36 : vector<32x64xf32>
    %cst_30 = arith.constant 0.000000e+00 : f32
    %38 = vector.broadcast %cst_30 : f32 to vector<32x64xf32>
    %39 = arith.maximumf %37, %38 : vector<32x64xf32>
    %c0_31 = arith.constant 0 : index
    %c0_32 = arith.constant 0 : index
    %40 = vector.load %arg12[%c0_31, %c0_32] : memref<64x4xf32, #tpu.memory_space<vmem>>, vector<64x4xf32>
    %cst_33 = arith.constant dense<0.000000e+00> : vector<32x4xf32>
    %41 = tpu.matmul %39, %40, %cst_33 {dimension_numbers = #tpu.dot_dimension_numbers<[1], [0], [0], [1], [0, 0, 1, 1], [], []>} : vector<32x64xf32>, vector<64x4xf32>, vector<32x4xf32> -> vector<32x4xf32>
    %c0_34 = arith.constant 0 : index
    %c0_35 = arith.constant 0 : index
    %42 = vector.load %arg13[%c0_34, %c0_35] : memref<1x4xf32, #tpu.memory_space<vmem>>, vector<1x4xf32>
    %43 = vector.broadcast %42 : vector<1x4xf32> to vector<32x4xf32>
    %44 = arith.addf %41, %43 : vector<32x4xf32>
    %c0_36 = arith.constant 0 : index
    %c0_37 = arith.constant 0 : index
    %45 = vector.load %arg14[%c0_36, %c0_37] : memref<32x4xf32, #tpu.memory_space<vmem>>, vector<32x4xf32>
    tpu.vector_store %arg14[%c0_36, %c0_37], %44 {strides = array<i32>} : memref<32x4xf32, #tpu.memory_space<vmem>>, vector<32x4xf32>,
    return
  }
  func.func @transform_0(%arg0: i32) -> (i32, i32) {
    %c0_i32 = arith.constant 0 : i32
    %c0_i32_0 = arith.constant 0 : i32
    return %arg0, %c0_i32 : i32, i32
  }
  func.func @transform_1(%arg0: i32) -> (i32, i32) {
    %c0_i32 = arith.constant 0 : i32
    %c0_i32_0 = arith.constant 0 : i32
    %c0_i32_1 = arith.constant 0 : i32
    return %c0_i32, %c0_i32_0 : i32, i32
  }
  func.func @transform_2(%arg0: i32) -> (i32, i32) {
    %c0_i32 = arith.constant 0 : i32
    %c0_i32_0 = arith.constant 0 : i32
    %c0_i32_1 = arith.constant 0 : i32
    return %c0_i32, %c0_i32_0 : i32, i32
  }
  func.func @transform_3(%arg0: i32) -> (i32, i32) {
    %c0_i32 = arith.constant 0 : i32
    %c0_i32_0 = arith.constant 0 : i32
    %c0_i32_1 = arith.constant 0 : i32
    return %c0_i32, %c0_i32_0 : i32, i32
  }
  func.func @transform_4(%arg0: i32) -> (i32, i32) {
    %c0_i32 = arith.constant 0 : i32
    %c0_i32_0 = arith.constant 0 : i32
    %c0_i32_1 = arith.constant 0 : i32
    return %c0_i32, %c0_i32_0 : i32, i32
  }
  func.func @transform_5(%arg0: i32) -> (i32, i32) {
    %c0_i32 = arith.constant 0 : i32
    %c0_i32_0 = arith.constant 0 : i32
    %c0_i32_1 = arith.constant 0 : i32
    return %c0_i32, %c0_i32_0 : i32, i32
  }
  func.func @transform_6(%arg0: i32) -> (i32, i32) {
    %c0_i32 = arith.constant 0 : i32
    %c0_i32_0 = arith.constant 0 : i32
    %c0_i32_1 = arith.constant 0 : i32
    return %c0_i32, %c0_i32_0 : i32, i32
  }
  func.func @transform_7(%arg0: i32) -> (i32, i32) {
    %c0_i32 = arith.constant 0 : i32
    %c0_i32_0 = arith.constant 0 : i32
    %c0_i32_1 = arith.constant 0 : i32
    return %c0_i32, %c0_i32_0 : i32, i32
  }
  func.func @transform_8(%arg0: i32) -> (i32, i32) {
    %c0_i32 = arith.constant 0 : i32
    %c0_i32_0 = arith.constant 0 : i32
    %c0_i32_1 = arith.constant 0 : i32
    return %c0_i32, %c0_i32_0 : i32, i32
  }
  func.func @transform_9(%arg0: i32) -> (i32, i32) {
    %c0_i32 = arith.constant 0 : i32
    %c0_i32_0 = arith.constant 0 : i32
    %c0_i32_1 = arith.constant 0 : i32
    return %c0_i32, %c0_i32_0 : i32, i32
  }
  func.func @transform_10(%arg0: i32) -> (i32, i32) {
    %c0_i32 = arith.constant 0 : i32
    %c0_i32_0 = arith.constant 0 : i32
    %c0_i32_1 = arith.constant 0 : i32
    return %c0_i32, %c0_i32_0 : i32, i32
  }
  func.func @transform_11(%arg0: i32) -> (i32, i32) {
    %c0_i32 = arith.constant 0 : i32
    %c0_i32_0 = arith.constant 0 : i32
    %c0_i32_1 = arith.constant 0 : i32
    return %c0_i32, %c0_i32_0 : i32, i32
  }
  func.func @transform_12(%arg0: i32) -> (i32, i32) {
    %c0_i32 = arith.constant 0 : i32
    %c0_i32_0 = arith.constant 0 : i32
    %c0_i32_1 = arith.constant 0 : i32
    return %c0_i32, %c0_i32_0 : i32, i32
  }
  func.func @transform_13(%arg0: i32) -> (i32, i32) {
    %c0_i32 = arith.constant 0 : i32
    %c0_i32_0 = arith.constant 0 : i32
    return %arg0, %c0_i32 : i32, i32
  }
}

</mosaic_0001>

<bundles_post_ra>
// kernel: tpu_custom_call.1
= control target key start
LH: loop header
LB: loop body
LE: loop exit
PB: predicated region body
PF: predicated region fallthrough
CT: control target
= control target key end

     0   :  { %18 = vsyncpa [#allocation3], 0  ;;  %s871_s0 = inlined_call_operand.hbm [shape: f32[32,32], index: 0, kind: input, shape index: {}]   ;;  %s872_s1 = inlined_call_operand.hbm [shape: f32[32,64], index: 1, kind: input, shape index: {}]   ;;  %s873_s2 = inlined_call_operand.vmem [shape: f32[1,64], index: 2, kind: input, shape index: {}]   ;;  %s874_s3 = inlined_call_operand.vmem [shape: f32[64,64], index: 3, kind: input, shape index: {}]   ;;  %s875_s4 = inlined_call_operand.vmem [shape: f32[1,64], index: 4, kind: input, shape index: {}]   ;;  %s876_s5 = inlined_call_operand.hbm [shape: f32[64,64], index: 5, kind: input, shape index: {}]   ;;  %s877_s6 = inlined_call_operand.vmem [shape: f32[1,64], index: 6, kind: input, shape index: {}]   ;;  %s878_s7 = inlined_call_operand.hbm [shape: f32[64,64], index: 7, kind: input, shape index: {}]   ;;  %s879_s8 = inlined_call_operand.vmem [shape: f32[1,64], index: 8, kind: input, shape index: {}]   ;;  %s880_s9 = inlined_call_operand.hbm [shape: f32[64,64], index: 9, kind: input, shape index: {}]   ;;  %s881_s10 = inlined_call_operand.vmem [shape: f32[1,64], index: 10, kind: input, shape index: {}]   ;;  %s882_s11 = inlined_call_operand.vmem [shape: f32[64,4], index: 11, kind: input, shape index: {}]   ;;  %s883_s12 = inlined_call_operand.vmem [shape: f32[1,4], index: 12, kind: input, shape index: {}]   ;;  %s884_s13 = inlined_call_operand.vmem [shape: f32[32,4], index: 13, kind: output, shape index: {}]  }
   0x1   :  { %19 = vsyncpa [#allocation5], 0 }
   0x2   :  { %20 = vsyncpa [#allocation8], 0  ;;  %s38_s27 = sshll.u32 %s872_s1, 4  ;;  %s661_s28 = smov [#allocation4]   ;;  %s39_s27 = int_to_ptr.hbm [resolvable:$true] %s38_s27 }
   0x3   :  { %s40_s29 = sshll.u32 %s661_s28, 4  ;;  %s72_s15 = sshll.u32 %s878_s7, 4  ;;  %s41_s29 = int_to_ptr.vmem [resolvable:$true] %s40_s29  ;;  %s73_s15 = int_to_ptr.hbm [resolvable:$true] %s72_s15 }
   0x4   :  { %s662_s16 = smov 128   ;;  %s663_s17 = smov 8  }
   0x5   :  { %46 = dma.hbm_to_vmem [thread:$0]  %s39_s27, 512, %s41_s29, [#allocation5], %s662_s16, %s662_s16, %s663_s17  }
   0x6   :  { %s664_s18 = smov [#allocation7]   ;;  %s25_s22 = sshll.u32 %s871_s0, 4  ;;  %s26_s22 = int_to_ptr.hbm [resolvable:$true] %s25_s22 }
   0x7   :  { %s74_s19 = sshll.u32 %s664_s18, 4  ;;  %s57_s24 = sshll.u32 %s876_s5, 4  ;;  %s75_s19 = int_to_ptr.vmem [resolvable:$true] %s74_s19  ;;  %s58_s24 = int_to_ptr.hbm [resolvable:$true] %s57_s24 }
   0x8   :  { %80 = dma.hbm_to_vmem [thread:$0]  %s73_s15, 1024, %s75_s19, [#allocation8], %s662_s16, %s662_s16, %s663_s17  }
   0x9   :  { %s665_s25 = smov [#allocation2]   ;;  %s666_s7 = smov [#allocation6]  }
   0xa   :  { %s27_s26 = sshll.u32 %s665_s25, 4  ;;  %s59_s27 = sshll.u32 %s666_s7, 4  ;;  %s28_s26 = int_to_ptr.vmem [resolvable:$true] %s27_s26  ;;  %s60_s27 = int_to_ptr.vmem [resolvable:$true] %s59_s27 }
   0xb   :  { %33 = dma.hbm_to_vmem [thread:$0]  %s26_s22, 512, %s28_s26, [#allocation3], %s662_s16, %s662_s16, %s663_s17  }
   0xc   :  { %s87_s30 = sshll.u32 %s880_s9, 4  ;;  %s667_s0 = smov [#allocation9]   ;;  %s88_s30 = int_to_ptr.hbm [resolvable:$true] %s87_s30 }
   0xd   :  { %65 = dma.hbm_to_vmem [thread:$0]  %s58_s24, 1024, %s60_s27, [#allocation5], %s662_s16, %s662_s16, %s663_s17  }
   0xe   :  { %s89_s14 = sshll.u32 %s667_s0, 4  ;;  %s90_s14 = int_to_ptr.vmem [resolvable:$true] %s89_s14 }
   0xf   :  { %95 = dma.hbm_to_vmem [thread:$0]  %s88_s30, 1024, %s90_s14, [#allocation8], %s662_s16, %s662_s16, %s663_s17  }
  0x10   :  { %655 = dma.done.wait [#allocation3], 512  }
  0x11   :  { %656 = vsyncadd [#allocation3], 4294966784 }
  0x12   :  { %657 = dma.done.wait [#allocation5], 1536  }
  0x13   :  { %658 = vsyncadd [#allocation5], 4294965760 }
  0x14   :  { %659 = dma.done.wait [#allocation8], 2048  }
  0x15   :  { %660 = vsyncadd [#allocation8], 4294965248  ;;  %v133_v0 = vld [vmem:[#allocation4 + $0x18] sm:$0xff]  ;;  %v132_v1 = vld [vmem:[#allocation4 + $0x10] sm:$0xff]  ;;  %vm138_vm0 = vcmask 261120   ;;  %vm196_vm1 = vcmask 523264  }
  0x16   :  { %163 = vmatpush.msra.mxu0 %v133_v0  ;;  %510 = vmatpush.msra.mxu3 %v133_v0  ;;  %v122_v2 = vld [vmem:[#allocation2] sm:$0xff]  ;;  %v124_v3 = vld [vmem:[#allocation2 + $0x10] sm:$0xff]  ;;  %v131_v4 = vld [vmem:[#allocation4 + $0x8] sm:$0xff]  ;;  %vm474_vm2 = vcmask 31744  }
  0x17   :  { %v191_v5 = vld [vmem:[%s874_s3 + $0x38] sm:$0xff]  ;;  %v190_v6 = vld [vmem:[%s874_s3 + $0x30] sm:$0xff]  ;;  %v130_v7 = vld [vmem:[#allocation4] sm:$0xff]  ;;  %v126_v8 = vmax.f32 %v122_v2, 0.0  ;;  %v128_v9 = vmax.f32 %v124_v3, 0.0 }
  0x18   :  { %164 = vmatpush.msra.mxu0 %v132_v1  ;;  %511 = vmatpush.msra.mxu3 %v132_v1  ;;  %v189_v10 = vld [vmem:[%s874_s3 + $0x28] sm:$0xff]  ;;  %v188_v11 = vld [vmem:[%s874_s3 + $0x20] sm:$0xff]  ;;  %v125_v13 = vld [vmem:[#allocation2 + $0x18] sm:$0xff] }
  0x19   :  { %217 = vmatpush.msra.mxu1 %v191_v5  ;;  %514 = vmatpush.msra.mxu2 %v191_v5  ;;  %v123_v12 = vld [vmem:[#allocation2 + $0x8] sm:$0xff]  ;;  %v187_v14 = vld [vmem:[%s874_s3 + $0x18] sm:$0xff]  ;;  %v129_v16 = vmax.f32 %v125_v13, 0.0  ;;  %v186_v17 = vld [vmem:[%s874_s3 + $0x10] sm:$0xff] }
  0x1a   :  { %165 = vmatpush.msra.mxu0 %v131_v4  ;;  %512 = vmatpush.msra.mxu3 %v131_v4  ;;  %v127_v15 = vmax.f32 %v123_v12, 0.0  ;;  %v185_v18 = vld [vmem:[%s874_s3 + $0x8] sm:$0xff]  ;;  %v184_v19 = vld [vmem:[%s874_s3] sm:$0xff]  ;;  %v249_v20 = vld [vmem:[#allocation6 + $0x38] sm:$0xff] }
  0x1b   :  { %218 = vmatpush.msra.mxu1 %v190_v6  ;;  %515 = vmatpush.msra.mxu2 %v190_v6  ;;  %v248_v21 = vld [vmem:[#allocation6 + $0x30] sm:$0xff]  ;;  %v247_v22 = vld [vmem:[#allocation6 + $0x28] sm:$0xff]  ;;  %v246_v23 = vld [vmem:[#allocation6 + $0x20] sm:$0xff] }
  0x1c   :  { %166 = vmatpush.msra.mxu0 %v130_v7  ;;  %513 = vmatpush.msra.mxu3 %v130_v7  ;;  %v245_v24 = vld [vmem:[#allocation6 + $0x18] sm:$0xff]  ;;  %v244_v25 = vld [vmem:[#allocation6 + $0x10] sm:$0xff]  ;;  %v529_v26 = vld [vmem:[%s873_s2] ss:$0 sm:$0xff] }
  0x1d   :  { %486 = vmatmul.msk.f32.vlgmr.msra.gmra.mxu0 %vm138_vm0, %v126_v8  ;;  %488 = vmatmul.msk.f32.vlgmr.msra.gmra.mxu3 %vm138_vm0, %v128_v9  ;;  %v243_v39 = vld [vmem:[#allocation6 + $0x8] sm:$0xff]  ;;  %v242_v40 = vld [vmem:[#allocation6] sm:$0xff]  ;;  %v310_v42 = vld [vmem:[#allocation7 + $0x38] sm:$0xff] }
  0x1e   :  { %219 = vmatpush.msra.mxu1 %v189_v10  ;;  %516 = vmatpush.msra.mxu2 %v189_v10  ;;  %v530_v41 = vld [vmem:[%s875_s4] ss:$0 sm:$0xff]  ;;  %v309_v43 = vld [vmem:[#allocation7 + $0x30] sm:$0xff]  ;;  %v308_v44 = vld [vmem:[#allocation7 + $0x28] sm:$0xff] }
  0x1f   :  { %335 = vmatpush.msrb.mxu3 %v310_v42  ;;  %v307_v47 = vld [vmem:[#allocation7 + $0x20] sm:$0xff]  ;;  %v306_v49 = vld [vmem:[#allocation7 + $0x18] sm:$0xff]  ;;  %v305_v59 = vld [vmem:[#allocation7 + $0x10] sm:$0xff] }
  0x20   :  { %220 = vmatpush.msra.mxu1 %v188_v11  ;;  %517 = vmatpush.msra.mxu2 %v188_v11  ;;  %v304_v60 = vld [vmem:[#allocation7 + $0x8] sm:$0xff]  ;;  %v303_v61 = vld [vmem:[#allocation7] sm:$0xff]  ;;  %v367_v63 = vld [vmem:[#allocation9 + $0x38] sm:$0xff] }
  0x21   :  { %336 = vmatpush.msrb.mxu3 %v309_v43  ;;  %v531_v62 = vld [vmem:[%s877_s6] ss:$0 sm:$0xff]  ;;  %v366_v0 = vld [vmem:[#allocation9 + $0x30] sm:$0xff]  ;;  %392 = vmatpush.msrb.mxu0 %v367_v63  ;;  %v365_v3 = vld [vmem:[#allocation9 + $0x28] sm:$0xff] }
  0x22   :  { %221 = vmatpush.msra.mxu1 %v187_v14  ;;  %518 = vmatpush.msra.mxu2 %v187_v14  ;;  %v364_v5 = vld [vmem:[#allocation9 + $0x20] sm:$0xff]  ;;  %v363_v7 = vld [vmem:[#allocation9 + $0x18] sm:$0xff]  ;;  %v362_v8 = vld [vmem:[#allocation9 + $0x10] sm:$0xff] }
  0x23   :  { %337 = vmatpush.msrb.mxu3 %v308_v44  ;;  %393 = vmatpush.msrb.mxu0 %v366_v0  ;;  %v422_v42 = vld [vmem:[%s882_s11 + $0x8] sm:$0xff]  ;;  %v421_v43 = vld [vmem:[%s882_s11] sm:$0xff] }
  0x24   :  { %222 = vmatpush.msra.mxu1 %v186_v17  ;;  %519 = vmatpush.msra.mxu2 %v186_v17  ;;  %v533_v44 = vld [vmem:[%s881_s10] ss:$0 sm:$0xff] }
  0x25   :  { %487 = vmatmul.msk.f32.gmra.mxu0 %vm138_vm0, %v127_v15  ;;  %489 = vmatmul.msk.f32.gmra.mxu3 %vm138_vm0, %v129_v16 }
  0x26   :  { %223 = vmatpush.msra.mxu1 %v185_v18  ;;  %520 = vmatpush.msra.mxu2 %v185_v18 }
  0x27   :  { %338 = vmatpush.msrb.mxu3 %v307_v47  ;;  %394 = vmatpush.msrb.mxu0 %v365_v3 }
  0x28   :  { %224 = vmatpush.msra.mxu1 %v184_v19  ;;  %521 = vmatpush.msra.mxu2 %v184_v19 }
  0x29   :  { %339 = vmatpush.msrb.mxu3 %v306_v49  ;;  %395 = vmatpush.msrb.mxu0 %v364_v5 }
  0x2a   :  { %274 = vmatpush.msrb.mxu2 %v249_v20 }
  0x2b   :  { %340 = vmatpush.msrb.mxu3 %v305_v59  ;;  %396 = vmatpush.msrb.mxu0 %v363_v7 }
  0x2c   :  { %275 = vmatpush.msrb.mxu2 %v248_v21  ;;  %v361_v21 = vld [vmem:[#allocation9 + $0x8] sm:$0xff] }
  0x2d   :  { %341 = vmatpush.msrb.mxu3 %v304_v60  ;;  %397 = vmatpush.msrb.mxu0 %v362_v8 }
  0x2e   :  { %276 = vmatpush.msrb.mxu2 %v247_v22  ;;  %v360_v22 = vld [vmem:[#allocation9] sm:$0xff] }
  0x2f   :  { %342 = vmatpush.msrb.mxu3 %v303_v61  ;;  %398 = vmatpush.msrb.mxu0 %v361_v21  ;;  %v534_v61 = vld [vmem:[%s883_s12] ss:$0 sm:$0xff] }
  0x30   :  { %277 = vmatpush.msrb.mxu2 %v246_v23  ;;  %v532_v23 = vld [vmem:[%s879_s8] ss:$0 sm:$0xff] }
  0x31   :  { %399 = vmatpush.msrb.mxu0 %v360_v22 }
  0x32   :  { %278 = vmatpush.msrb.mxu2 %v245_v24  ;;  %v428_v24 = vld [vmem:[%s882_s11 + $0x38] sm:$0xff] }
  0x33   :  { %453 = vmatpush.msrb.mxu1 %v428_v24 }
  0x34   :  { %279 = vmatpush.msrb.mxu2 %v244_v25  ;;  %v427_v25 = vld [vmem:[%s882_s11 + $0x30] sm:$0xff] }
  0x35   :  { %454 = vmatpush.msrb.mxu1 %v427_v25 }
  0x36   :  { %280 = vmatpush.msrb.mxu2 %v243_v39 }
  0x38   :  { %281 = vmatpush.msrb.mxu2 %v242_v40 }
  0x9a   :  { %v168_v27 = vpop.f32.mrf.mxu0 }
  0x9b   :  { %v169_v28 = vadd.f32 %v529_v26, %v168_v27 }
  0x9d   :  { %v180_v29 = vmax.f32 %v169_v28, 0.0 }
  0x9f   :  { %490 = vmatmul.msk.f32.vlgmr.msra.gmra.mxu1 %vm196_vm1, %v180_v29  ;;  %v425_v29 = vld [vmem:[%s882_s11 + $0x20] sm:$0xff] }
  0xa0   :  { %v174_v30 = vpop.f32.mrf.mxu3 }
  0xa1   :  { %v785_v31 = vadd.f32 %v529_v26, %v174_v30 }
  0xa2   :  { %v171_v32 = vpop.f32.mrf.mxu0 }
  0xa3   :  { %v787_v33 = vadd.f32 %v529_v26, %v171_v32  ;;  %v182_v34 = vmax.f32 %v785_v31, 0.0 }
  0xa5   :  { %v181_v35 = vmax.f32 %v787_v33, 0.0  ;;  %492 = vmatmul.msk.f32.vlgmr.msra.gmra.mxu2 %vm196_vm1, %v182_v34 }
  0xa7   :  { %491 = vmatmul.msk.f32.gmra.mxu1 %vm196_vm1, %v181_v35 }
  0xa8   :  { %v177_v36 = vpop.f32.mrf.mxu3 }
  0xa9   :  { %v793_v37 = vadd.f32 %v529_v26, %v177_v36  ;;  %v426_v26 = vld [vmem:[%s882_s11 + $0x28] sm:$0xff] }
  0xaa   :  { %455 = vmatpush.msrb.mxu1 %v426_v26 }
  0xab   :  { %v183_v38 = vmax.f32 %v793_v37, 0.0 }
  0xac   :  { %456 = vmatpush.msrb.mxu1 %v425_v29 }
  0xad   :  { %493 = vmatmul.msk.f32.gmra.mxu2 %vm196_vm1, %v183_v38 }
 0x11c   :  { %v226_v45 = vpop.f32.mrf.mxu1 }
 0x11d   :  { %v227_v46 = vadd.f32 %v530_v41, %v226_v45 }
 0x11f   :  { %v238_v48 = vmax.f32 %v227_v46, 0.0 }
 0x121   :  { %494 = vmatmul.msk.f32.vlgmr.msrb.gmra.mxu2 %vm196_vm1, %v238_v48 }
 0x124   :  { %v229_v50 = vpop.f32.mrf.mxu1 }
 0x125   :  { %v230_v51 = vadd.f32 %v530_v41, %v229_v50 }
 0x127   :  { %v239_v52 = vmax.f32 %v230_v51, 0.0 }
 0x128   :  { %v232_v53 = vpop.f32.mrf.mxu2 }
 0x129   :  { %495 = vmatmul.msk.f32.gmra.mxu2 %vm196_vm1, %v239_v52  ;;  %v233_v54 = vadd.f32 %v530_v41, %v232_v53 }
 0x12b   :  { %v240_v55 = vmax.f32 %v233_v54, 0.0 }
 0x130   :  { %v235_v56 = vpop.f32.mrf.mxu2 }
 0x131   :  { %496 = vmatmul.msk.f32.gmra.mxu2 %vm196_vm1, %v240_v55  ;;  %v236_v57 = vadd.f32 %v530_v41, %v235_v56  ;;  %v423_v41 = vld [vmem:[%s882_s11 + $0x10] sm:$0xff] }
 0x133   :  { %v241_v58 = vmax.f32 %v236_v57, 0.0 }
 0x139   :  { %497 = vmatmul.msk.f32.gmra.mxu2 %vm196_vm1, %v241_v58 }
 0x1a4   :  { %v283_v1 = vpop.f32.mrf.mxu2 }
 0x1a5   :  { %v284_v2 = vadd.f32 %v531_v62, %v283_v1 }
 0x1a7   :  { %v807_v4 = vadd.f32 %v284_v2, %v169_v28 }
 0x1a9   :  { %v299_v6 = vmax.f32 %v807_v4, 0.0 }
 0x1ab   :  { %498 = vmatmul.msk.f32.vlgmr.msrb.gmra.mxu3 %vm196_vm1, %v299_v6 }
 0x1ac   :  { %v286_v9 = vpop.f32.mrf.mxu2 }
 0x1ad   :  { %v287_v10 = vadd.f32 %v531_v62, %v286_v9 }
 0x1af   :  { %v296_v11 = vadd.f32 %v287_v10, %v787_v33 }
 0x1b1   :  { %v300_v12 = vmax.f32 %v296_v11, 0.0 }
 0x1b3   :  { %499 = vmatmul.msk.f32.gmra.mxu3 %vm196_vm1, %v300_v12 }
 0x1b4   :  { %v289_v13 = vpop.f32.mrf.mxu2 }
 0x1b5   :  { %v290_v14 = vadd.f32 %v531_v62, %v289_v13 }
 0x1b7   :  { %v297_v15 = vadd.f32 %v290_v14, %v785_v31  ;;  %v424_v31 = vld [vmem:[%s882_s11 + $0x18] sm:$0xff] }
 0x1b8   :  { %457 = vmatpush.msrb.mxu1 %v424_v31 }
 0x1b9   :  { %v301_v16 = vmax.f32 %v297_v15, 0.0 }
 0x1ba   :  { %458 = vmatpush.msrb.mxu1 %v423_v41 }
 0x1bb   :  { %500 = vmatmul.msk.f32.gmra.mxu3 %vm196_vm1, %v301_v16 }
 0x1bc   :  { %v292_v17 = vpop.f32.mrf.mxu2  ;;  %459 = vmatpush.msrb.mxu1 %v422_v42 }
 0x1bd   :  { %v293_v18 = vadd.f32 %v531_v62, %v292_v17 }
 0x1be   :  { %460 = vmatpush.msrb.mxu1 %v421_v43 }
 0x1bf   :  { %v298_v19 = vadd.f32 %v293_v18, %v793_v37 }
 0x1c1   :  { %v302_v20 = vmax.f32 %v298_v19, 0.0 }
 0x1c3   :  { %501 = vmatmul.msk.f32.gmra.mxu3 %vm196_vm1, %v302_v20 }
 0x22e   :  { %v344_v27 = vpop.f32.mrf.mxu3 }
 0x22f   :  { %v345_v28 = vadd.f32 %v532_v23, %v344_v27 }
 0x231   :  { %v356_v30 = vmax.f32 %v345_v28, 0.0 }
 0x233   :  { %502 = vmatmul.msk.f32.vlgmr.msrb.gmra.mxu0 %vm196_vm1, %v356_v30 }
 0x236   :  { %v347_v32 = vpop.f32.mrf.mxu3 }
 0x237   :  { %v348_v33 = vadd.f32 %v532_v23, %v347_v32 }
 0x239   :  { %v357_v34 = vmax.f32 %v348_v33, 0.0 }
 0x23b   :  { %503 = vmatmul.msk.f32.gmra.mxu0 %vm196_vm1, %v357_v34 }
 0x23e   :  { %v350_v35 = vpop.f32.mrf.mxu3 }
 0x23f   :  { %v351_v36 = vadd.f32 %v532_v23, %v350_v35 }
 0x241   :  { %v358_v37 = vmax.f32 %v351_v36, 0.0 }
 0x243   :  { %504 = vmatmul.msk.f32.gmra.mxu0 %vm196_vm1, %v358_v37 }
 0x246   :  { %v353_v38 = vpop.f32.mrf.mxu3 }
 0x247   :  { %v354_v39 = vadd.f32 %v532_v23, %v353_v38 }
 0x249   :  { %v359_v40 = vmax.f32 %v354_v39, 0.0 }
 0x24b   :  { %505 = vmatmul.msk.f32.gmra.mxu0 %vm196_vm1, %v359_v40 }
 0x2b0   :  { %v401_v45 = vpop.f32.mrf.mxu0 }
 0x2b1   :  { %v402_v46 = vadd.f32 %v533_v44, %v401_v45 }
 0x2b3   :  { %v413_v47 = vadd.f32 %v402_v46, %v807_v4 }
 0x2b5   :  { %v417_v48 = vmax.f32 %v413_v47, 0.0 }
 0x2b7   :  { %506 = vmatmul.msk.f32.vlgmr.msrb.gmra.mxu1 %vm196_vm1, %v417_v48 }
 0x2b8   :  { %v404_v49 = vpop.f32.mrf.mxu0 }
 0x2b9   :  { %v405_v50 = vadd.f32 %v533_v44, %v404_v49 }
 0x2bb   :  { %v414_v51 = vadd.f32 %v405_v50, %v296_v11 }
 0x2bd   :  { %v418_v52 = vmax.f32 %v414_v51, 0.0 }
 0x2bf   :  { %507 = vmatmul.msk.f32.gmra.mxu1 %vm196_vm1, %v418_v52 }
 0x2c0   :  { %v407_v53 = vpop.f32.mrf.mxu0 }
 0x2c1   :  { %v408_v54 = vadd.f32 %v533_v44, %v407_v53 }
 0x2c3   :  { %v415_v55 = vadd.f32 %v408_v54, %v297_v15 }
 0x2c5   :  { %v419_v56 = vmax.f32 %v415_v55, 0.0 }
 0x2c7   :  { %508 = vmatmul.msk.f32.gmra.mxu1 %vm196_vm1, %v419_v56 }
 0x2c8   :  { %v410_v57 = vpop.f32.mrf.mxu0 }
 0x2c9   :  { %v411_v58 = vadd.f32 %v533_v44, %v410_v57 }
 0x2cb   :  { %v416_v59 = vadd.f32 %v411_v58, %v298_v19 }
 0x2cd   :  { %v420_v60 = vmax.f32 %v416_v59, 0.0 }
 0x2cf   :  { %509 = vmatmul.msk.f32.gmra.mxu1 %vm196_vm1, %v420_v60 }
 0x334   :  { %v462_v62 = vpop.f32.mrf.mxu1 }
 0x335   :  { %v463_v63 = vadd.f32 %v534_v61, %v462_v62 }
 0x337   :  { %475 = vst.msk [vmem:[%s884_s13] sm:$0xff] %vm474_vm2, %v463_v63 }
 0x33c   :  { %v465_v0 = vpop.f32.mrf.mxu1 }
 0x33d   :  { %v466_v1 = vadd.f32 %v534_v61, %v465_v0 }
 0x33f   :  { %476 = vst.msk [vmem:[%s884_s13 + $0x8] sm:$0xff] %vm474_vm2, %v466_v1 }
 0x344   :  { %v468_v2 = vpop.f32.mrf.mxu1 }
 0x345   :  { %v469_v3 = vadd.f32 %v534_v61, %v468_v2 }
 0x347   :  { %477 = vst.msk [vmem:[%s884_s13 + $0x10] sm:$0xff] %vm474_vm2, %v469_v3 }
 0x34c   :  { %v471_v4 = vpop.f32.mrf.mxu1 }
 0x34d   :  { %v472_v5 = vadd.f32 %v534_v61, %v471_v4 }
 0x34f   :  { %478 = vst.msk [vmem:[%s884_s13 + $0x18] sm:$0xff] %vm474_vm2, %v472_v5 }
 0x350   :  { %483 = vsyncpa [#allocation3], 1 }
 0x351   :  { %484 = vsyncpa [#allocation5], 1 }
 0x352   :  { %485 = vsyncpa [#allocation8], 1 }

</bundles_post_ra>
